<compile_context>
chip_gen: v6e
topology: v6e:2x2x1
jax: 0.10.0
libtpu: 0.0.40
codegen_flags: <defaults>
</compile_context>

<pallas_src>
import jax
import jax.numpy as jnp
from jax.experimental import pallas as pl
from jax.experimental.pallas import tpu as pltpu


def _fused_pool_bn_gelu_kernel(x_ref, r_ref, scale_ref, bias_ref, ox_ref, or_ref):
    # x_ref / r_ref: (K, block_n)  -- K on sublanes, lanes dense
    # scale_ref / bias_ref / ox_ref / or_ref: (1, block_n)
    inv_k = 1.0 / x_ref.shape[0]          # K is always fully resident in the block
    scale = scale_ref[...]
    bias = bias_ref[...]

    def pool_bn_gelu(v_ref, o_ref):
        v = v_ref[...].astype(jnp.float32)                    # (K, block_n)
        pooled = (jnp.max(v, axis=0, keepdims=True)
                  + jnp.sum(v, axis=0, keepdims=True) * inv_k)  # (1, block_n)
        y = pooled * scale + bias                             # folded BN affine
        # exact GELU (erf form), matching torch.nn.GELU() default
        g = 0.5 * y * (1.0 + jax.lax.erf(y * 0.7071067811865476))
        o_ref[...] = g.astype(o_ref.dtype)

    pool_bn_gelu(x_ref, ox_ref)
    pool_bn_gelu(r_ref, or_ref)


# Max lanes per block: K=8 f32 rows * 32768 lanes * 4 B * 2 inputs * 2 buffers ~= 4 MiB.
_MAX_BLOCK_LANES = 32768


def pooling_forward(knn_x_w, knn_rgbx_w, scale, bias):
    """Mirrors Pooling.forward for inference.

    knn_x_w, knn_rgbx_w : (B, C, G, K) float
    scale, bias         : (C,) float32, folded BatchNorm1d (inference) affine
    returns             : two arrays of shape (B, C, G)
    """
    B, C, G, K = knn_x_w.shape
    N = B * C * G

    # Relayout: reduction axis K -> sublanes, everything else flattened onto lanes.
    x2 = jnp.moveaxis(knn_x_w, -1, 0).reshape(K, N)
    r2 = jnp.moveaxis(knn_rgbx_w, -1, 0).reshape(K, N)

    # Pre-broadcast the per-channel affine to the flattened layout (plain JAX, tiny).
    scale_b = jnp.broadcast_to(
        scale.astype(jnp.float32).reshape(1, C, 1), (B, C, G)).reshape(1, N)
    bias_b = jnp.broadcast_to(
        bias.astype(jnp.float32).reshape(1, C, 1), (B, C, G)).reshape(1, N)

    # Single grid step at small N; lane-tiled (multiple of 128) for big N.
    block_n = N if N <= _MAX_BLOCK_LANES else _MAX_BLOCK_LANES
    grid_n = pl.cdiv(N, block_n)

    ox, orr = pl.pallas_call(
        _fused_pool_bn_gelu_kernel,
        out_shape=(
            jax.ShapeDtypeStruct((1, N), knn_x_w.dtype),
            jax.ShapeDtypeStruct((1, N), knn_rgbx_w.dtype),
        ),
        grid=(grid_n,),
        in_specs=[
            pl.BlockSpec((K, block_n), lambda i: (0, i)),
            pl.BlockSpec((K, block_n), lambda i: (0, i)),
            pl.BlockSpec((1, block_n), lambda i: (0, i)),
            pl.BlockSpec((1, block_n), lambda i: (0, i)),
        ],
        out_specs=(
            pl.BlockSpec((1, block_n), lambda i: (0, i)),
            pl.BlockSpec((1, block_n), lambda i: (0, i)),
        ),
        compiler_params=pltpu.CompilerParams(dimension_semantics=("parallel",)),
    )(x2, r2, scale_b, bias_b)

    return ox.reshape(B, C, G), orr.reshape(B, C, G)


def fold_bn(gamma, beta, running_mean, running_var, eps):
    """Fold inference-mode BatchNorm1d into per-channel (scale, bias)."""
    scale = gamma / jnp.sqrt(running_var + eps)
    bias = beta - running_mean * scale
    return scale, bias


def _reference(x, gamma, beta, r_mean, r_var, eps):
    pooled = jnp.max(x, axis=-1) + jnp.mean(x, axis=-1)
    c = (None, slice(None), None)
    y = (pooled - r_mean[c]) / jnp.sqrt(r_var[c] + eps) * gamma[c] + beta[c]
    return 0.5 * y * (1.0 + jax.lax.erf(y * 0.7071067811865476))


if __name__ == "__main__":
    B, C, G, K = 2, 32, 16, 8  # batch, out_dim, groups, k-neighbours

    key = jax.random.PRNGKey(0)
    k1, k2, k3, k4, k5, k6 = jax.random.split(key, 6)

    knn_x_w = jax.random.normal(k1, (B, C, G, K), jnp.float32)
    knn_rgbx_w = jax.random.normal(k2, (B, C, G, K), jnp.float32)

    # Deterministic BatchNorm1d(out_dim) parameters / running stats.
    gamma = 1.0 + 0.1 * jax.random.normal(k3, (C,), jnp.float32)
    beta = 0.1 * jax.random.normal(k4, (C,), jnp.float32)
    running_mean = 0.1 * jax.random.normal(k5, (C,), jnp.float32)
    running_var = jax.nn.softplus(jax.random.normal(k6, (C,), jnp.float32)) + 0.5
    eps = 1e-5

    scale, bias = fold_bn(gamma, beta, running_mean, running_var, eps)

    lc_x, lc_rgbx = pooling_forward(knn_x_w, knn_rgbx_w, scale, bias)
    lc_x = jax.block_until_ready(lc_x)
    lc_rgbx = jax.block_until_ready(lc_rgbx)

    # Sanity check against a pure-JAX reference of the same semantics.
    ref_x = _reference(knn_x_w, gamma, beta, running_mean, running_var, eps)
    ref_rgbx = _reference(knn_rgbx_w, gamma, beta, running_mean, running_var, eps)
    assert lc_x.shape == (B, C, G) and lc_rgbx.shape == (B, C, G)
    assert jnp.allclose(lc_x, ref_x, atol=1e-5, rtol=1e-5)
    assert jnp.allclose(lc_rgbx, ref_rgbx, atol=1e-5, rtol=1e-5)

    print("KERNEL_OK")
</pallas_src>

<mosaic_0001>
module attributes {stable_mosaic.version = 11 : i64} {
  func.func @_fused_pool_bn_gelu_kernel(%arg0: i32, %arg1: memref<8x1024xf32, #tpu.memory_space<vmem>>, %arg2: memref<8x1024xf32, #tpu.memory_space<vmem>>, %arg3: memref<1x1024xf32, #tpu.memory_space<vmem>>, %arg4: memref<1x1024xf32, #tpu.memory_space<vmem>>, %arg5: memref<1x1024xf32, #tpu.memory_space<vmem>>, %arg6: memref<1x1024xf32, #tpu.memory_space<vmem>>) attributes {dimension_semantics = [#tpu.dimension_semantics<parallel>], iteration_bounds = array<i64: 1>, scalar_prefetch = 0 : i64, scratch_operands = 0 : i64, tpu.core_type = #tpu.core_type<tc>, window_params = [{transform_indices = @transform_0, window_bounds = array<i64: 8, 1024>}, {transform_indices = @transform_1, window_bounds = array<i64: 8, 1024>}, {transform_indices = @transform_2, window_bounds = array<i64: 1, 1024>}, {transform_indices = @transform_3, window_bounds = array<i64: 1, 1024>}, {transform_indices = @transform_4, window_bounds = array<i64: 1, 1024>}, {transform_indices = @transform_5, window_bounds = array<i64: 1, 1024>}]} {
    %c0 = arith.constant 0 : index
    %c0_0 = arith.constant 0 : index
    %0 = vector.load %arg3[%c0, %c0_0] : memref<1x1024xf32, #tpu.memory_space<vmem>>, vector<1x1024xf32>
    %c0_1 = arith.constant 0 : index
    %c0_2 = arith.constant 0 : index
    %1 = vector.load %arg4[%c0_1, %c0_2] : memref<1x1024xf32, #tpu.memory_space<vmem>>, vector<1x1024xf32>
    %c0_3 = arith.constant 0 : index
    %c0_4 = arith.constant 0 : index
    %2 = vector.load %arg1[%c0_3, %c0_4] : memref<8x1024xf32, #tpu.memory_space<vmem>>, vector<8x1024xf32>
    %cst = arith.constant dense<0xFF800000> : vector<1024xf32>
    %3 = vector.multi_reduction <maximumf>, %2, %cst [0] : vector<8x1024xf32> to vector<1024xf32>
    %4 = vector.shape_cast %3 : vector<1024xf32> to vector<1x1024xf32>
    %cst_5 = arith.constant dense<0.000000e+00> : vector<1024xf32>
    %5 = vector.multi_reduction <add>, %2, %cst_5 [0] : vector<8x1024xf32> to vector<1024xf32>
    %6 = vector.shape_cast %5 : vector<1024xf32> to vector<1x1024xf32>
    %cst_6 = arith.constant 1.250000e-01 : f32
    %7 = vector.broadcast %cst_6 : f32 to vector<1x1024xf32>
    %8 = arith.mulf %6, %7 : vector<1x1024xf32>
    %9 = arith.addf %4, %8 : vector<1x1024xf32>
    %10 = arith.mulf %9, %0 : vector<1x1024xf32>
    %11 = arith.addf %10, %1 : vector<1x1024xf32>
    %cst_7 = arith.constant 5.000000e-01 : f32
    %12 = vector.broadcast %cst_7 : f32 to vector<1x1024xf32>
    %13 = arith.mulf %12, %11 : vector<1x1024xf32>
    %cst_8 = arith.constant 0.707106769 : f32
    %14 = vector.broadcast %cst_8 : f32 to vector<1x1024xf32>
    %15 = arith.mulf %11, %14 : vector<1x1024xf32>
    %16 = math.erf %15 : vector<1x1024xf32>
    %cst_9 = arith.constant 1.000000e+00 : f32
    %17 = vector.broadcast %cst_9 : f32 to vector<1x1024xf32>
    %18 = arith.addf %17, %16 : vector<1x1024xf32>
    %19 = arith.mulf %13, %18 : vector<1x1024xf32>
    %c0_10 = arith.constant 0 : index
    %c0_11 = arith.constant 0 : index
    %20 = vector.load %arg5[%c0_10, %c0_11] : memref<1x1024xf32, #tpu.memory_space<vmem>>, vector<1x1024xf32>
    tpu.vector_store %arg5[%c0_10, %c0_11], %19 {strides = array<i32>} : memref<1x1024xf32, #tpu.memory_space<vmem>>, vector<1x1024xf32>,
    %c0_12 = arith.constant 0 : index
    %c0_13 = arith.constant 0 : index
    %21 = vector.load %arg2[%c0_12, %c0_13] : memref<8x1024xf32, #tpu.memory_space<vmem>>, vector<8x1024xf32>
    %cst_14 = arith.constant dense<0xFF800000> : vector<1024xf32>
    %22 = vector.multi_reduction <maximumf>, %21, %cst_14 [0] : vector<8x1024xf32> to vector<1024xf32>
    %23 = vector.shape_cast %22 : vector<1024xf32> to vector<1x1024xf32>
    %cst_15 = arith.constant dense<0.000000e+00> : vector<1024xf32>
    %24 = vector.multi_reduction <add>, %21, %cst_15 [0] : vector<8x1024xf32> to vector<1024xf32>
    %25 = vector.shape_cast %24 : vector<1024xf32> to vector<1x1024xf32>
    %cst_16 = arith.constant 1.250000e-01 : f32
    %26 = vector.broadcast %cst_16 : f32 to vector<1x1024xf32>
    %27 = arith.mulf %25, %26 : vector<1x1024xf32>
    %28 = arith.addf %23, %27 : vector<1x1024xf32>
    %29 = arith.mulf %28, %0 : vector<1x1024xf32>
    %30 = arith.addf %29, %1 : vector<1x1024xf32>
    %cst_17 = arith.constant 5.000000e-01 : f32
    %31 = vector.broadcast %cst_17 : f32 to vector<1x1024xf32>
    %32 = arith.mulf %31, %30 : vector<1x1024xf32>
    %cst_18 = arith.constant 0.707106769 : f32
    %33 = vector.broadcast %cst_18 : f32 to vector<1x1024xf32>
    %34 = arith.mulf %30, %33 : vector<1x1024xf32>
    %35 = math.erf %34 : vector<1x1024xf32>
    %cst_19 = arith.constant 1.000000e+00 : f32
    %36 = vector.broadcast %cst_19 : f32 to vector<1x1024xf32>
    %37 = arith.addf %36, %35 : vector<1x1024xf32>
    %38 = arith.mulf %32, %37 : vector<1x1024xf32>
    %c0_20 = arith.constant 0 : index
    %c0_21 = arith.constant 0 : index
    %39 = vector.load %arg6[%c0_20, %c0_21] : memref<1x1024xf32, #tpu.memory_space<vmem>>, vector<1x1024xf32>
    tpu.vector_store %arg6[%c0_20, %c0_21], %38 {strides = array<i32>} : memref<1x1024xf32, #tpu.memory_space<vmem>>, vector<1x1024xf32>,
    return
  }
  func.func @transform_0(%arg0: i32) -> (i32, i32) {
    %c0_i32 = arith.constant 0 : i32
    %c0_i32_0 = arith.constant 0 : i32
    return %c0_i32, %arg0 : i32, i32
  }
  func.func @transform_1(%arg0: i32) -> (i32, i32) {
    %c0_i32 = arith.constant 0 : i32
    %c0_i32_0 = arith.constant 0 : i32
    return %c0_i32, %arg0 : i32, i32
  }
  func.func @transform_2(%arg0: i32) -> (i32, i32) {
    %c0_i32 = arith.constant 0 : i32
    %c0_i32_0 = arith.constant 0 : i32
    return %c0_i32, %arg0 : i32, i32
  }
  func.func @transform_3(%arg0: i32) -> (i32, i32) {
    %c0_i32 = arith.constant 0 : i32
    %c0_i32_0 = arith.constant 0 : i32
    return %c0_i32, %arg0 : i32, i32
  }
  func.func @transform_4(%arg0: i32) -> (i32, i32) {
    %c0_i32 = arith.constant 0 : i32
    %c0_i32_0 = arith.constant 0 : i32
    return %c0_i32, %arg0 : i32, i32
  }
  func.func @transform_5(%arg0: i32) -> (i32, i32) {
    %c0_i32 = arith.constant 0 : i32
    %c0_i32_0 = arith.constant 0 : i32
    return %c0_i32, %arg0 : i32, i32
  }
}

</mosaic_0001>

<bundles_post_ra>
// kernel: tpu_custom_call.1
= control target key start
LH: loop header
LB: loop body
LE: loop exit
PB: predicated region body
PF: predicated region fallthrough
CT: control target
= control target key end

     0   :  { %11 = vsyncpa [#allocation3], 0  ;;  %s1118_s0 = inlined_call_operand.hbm [shape: f32[8,1024], index: 0, kind: input, shape index: {}]   ;;  %s1119_s1 = inlined_call_operand.hbm [shape: f32[8,1024], index: 1, kind: input, shape index: {}]   ;;  %s1120_s2 = inlined_call_operand.hbm [shape: f32[1,1024], index: 2, kind: input, shape index: {}]   ;;  %s1121_s3 = inlined_call_operand.hbm [shape: f32[1,1024], index: 3, kind: input, shape index: {}]   ;;  %s1122_s4 = inlined_call_operand.hbm [shape: f32[1,1024], index: 4, kind: output, shape index: {0}]   ;;  %s1123_s5 = inlined_call_operand.hbm [shape: f32[1,1024], index: 5, kind: output, shape index: {1}]  }
   0x1   :  { %12 = vsyncpa [#allocation6], 0 }
   0x2   :  { %13 = vsyncpa [#allocation9], 0 }
   0x3   :  { %14 = vsyncpa [#allocation4], 0 }
   0x4   :  { %15 = vsyncpa [#allocation12], 0  ;;  %s822_s18 = smov [#allocation5]   ;;  %s823_s20 = smov [#allocation2]  }
   0x5   :  { %s32_s19 = sshll.u32 %s822_s18, 4  ;;  %s22_s21 = sshll.u32 %s823_s20, 4  ;;  %s33_s19 = int_to_ptr.vmem [resolvable:$true] %s32_s19  ;;  %s23_s21 = int_to_ptr.vmem [resolvable:$true] %s22_s21 }
   0x6   :  { %s700_s22 = scalar_lea.vmem %s33_s19, 1024  ;;  %p705_p1 = scmp.lt.s32.totalorder %s33_s19, %s33_s19 }
   0x7   :  { %p701_p0 = scmp.ne.s32.totalorder %s33_s19, %s700_s22  ;;  %p706_p2 = scmp.lt.s32.totalorder %s700_s22, %s700_s22 }
   0x9   :  { %p707_p3 = por %p706_p2, %p705_p1 }
   0xb   :  { %p708_p4 = pnand %p707_p3, %p701_p0 }
   0xd   :  { %711 = shalt.err (!%p708_p4)
}
   0xe   :  { %35 = dma.hbm_to_vmem [thread:$0]  %s1119_s1, 1024, %s33_s19, [#allocation6]  }
   0xf   :  { %s720_s25 = scalar_lea.vmem %s23_s21, 1024  ;;  %p725_p6 = scmp.lt.s32.totalorder %s23_s21, %s23_s21 }
  0x10   :  { %p721_p5 = scmp.ne.s32.totalorder %s23_s21, %s720_s25  ;;  %p726_p7 = scmp.lt.s32.totalorder %s720_s25, %s720_s25 }
  0x12   :  { %p727_p8 = por %p726_p7, %p725_p6 }
  0x14   :  { %p728_p9 = pnand %p727_p8, %p721_p5 }
  0x16   :  { %731 = shalt.err (!%p728_p9)
}
  0x17   :  { %25 = dma.hbm_to_vmem [thread:$0]  %s1118_s0, 1024, %s23_s21, [#allocation3]  }
  0x18   :  { %s824_s28 = smov [#allocation7]   ;;  %s825_s30 = smov [#allocation8]  }
  0x19   :  { %s42_s29 = sshll.u32 %s824_s28, 4  ;;  %s52_s6 = sshll.u32 %s825_s30, 4  ;;  %s43_s29 = int_to_ptr.vmem [resolvable:$true] %s42_s29  ;;  %s53_s6 = int_to_ptr.vmem [resolvable:$true] %s52_s6 }
  0x1a   :  { %s740_s7 = scalar_lea.vmem %s43_s29, 128  ;;  %p745_p11 = scmp.lt.s32.totalorder %s43_s29, %s43_s29 }
  0x1b   :  { %p741_p10 = scmp.ne.s32.totalorder %s43_s29, %s740_s7  ;;  %p746_p12 = scmp.lt.s32.totalorder %s740_s7, %s740_s7 }
  0x1d   :  { %p747_p13 = por %p746_p12, %p745_p11 }
  0x1f   :  { %p748_p0 = pnand %p747_p13, %p741_p10 }
  0x21   :  { %751 = shalt.err (!%p748_p0)
}
  0x22   :  { %45 = dma.hbm_to_vmem [thread:$0]  %s1120_s2, 128, %s43_s29, [#allocation6]  }
  0x23   :  { %s760_s9 = scalar_lea.vmem %s53_s6, 128  ;;  %p765_p2 = scmp.lt.s32.totalorder %s53_s6, %s53_s6 }
  0x24   :  { %p761_p1 = scmp.ne.s32.totalorder %s53_s6, %s760_s9  ;;  %p766_p3 = scmp.lt.s32.totalorder %s760_s9, %s760_s9 }
  0x26   :  { %p767_p4 = por %p766_p3, %p765_p2 }
  0x28   :  { %p768_p5 = pnand %p767_p4, %p761_p1 }
  0x2a   :  { %771 = shalt.err (!%p768_p5)
}
  0x2b   :  { %55 = dma.hbm_to_vmem [thread:$0]  %s1121_s3, 128, %s53_s6, [#allocation9]  }
  0x2c   :  { %812 = dma.done.wait [#allocation3], 1024  }
  0x2d   :  { %813 = vsyncadd [#allocation3], 4294966272 }
  0x2e   :  { %814 = dma.done.wait [#allocation6], 1152  }
  0x2f   :  { %815 = vsyncadd [#allocation6], 4294966144 }
  0x30   :  { %816 = dma.done.wait [#allocation9], 128  }
  0x31   :  { %817 = vsyncadd [#allocation9], 4294967168  ;;  %v191_v0 = vlaneseq  ;;  %v826_v2 = vmov 1966171168   ;;  %v880_v9 = vld [vmem:[#allocation7] sm:$0xff]  ;;  %v71_v15 = vld [vmem:[#allocation2 + $0x8] sm:$0xff] }
  0x32   :  { %v873_v3 = vunpack.c.l.s4 %v826_v2  ;;  %v882_v10 = vld [vmem:[#allocation2] sm:$0xff]  ;;  %v72_v16 = vld [vmem:[#allocation2 + $0x10] sm:$0xff]  ;;  %v73_v17 = vld [vmem:[#allocation2 + $0x18] sm:$0xff]  ;;  %v84_v25 = vrot.slane %v71_v15, 4  ;;  %s827_s2 = smov [#allocation10]  }
  0x33   :  { %v871_v1 = vshrl.u32 %v191_v0, 7  ;;  %v78_v18 = vrot.slane %v882_v10, 4  ;;  %v74_v22 = vld [vmem:[#allocation2 + $0x20] sm:$0xff]  ;;  %v75_v23 = vld [vmem:[#allocation2 + $0x28] sm:$0xff]  ;;  %v76_v24 = vld [vmem:[#allocation2 + $0x30] sm:$0xff]  ;;  %v90_v26 = vrot.slane %v72_v16, 4 }
  0x34   :  { %v96_v27 = vrot.slane %v73_v17, 4  ;;  %v77_v29 = vld [vmem:[#allocation2 + $0x38] sm:$0xff]  ;;  %v102_v31 = vrot.slane %v74_v22, 4  ;;  %v108_v32 = vrot.slane %v75_v23, 4  ;;  %v114_v33 = vrot.slane %v76_v24, 4  ;;  %s628_s3 = sshll.u32 %s827_s2, 4  ;;  %s629_s3 = int_to_ptr.vmem [resolvable:$true] %s628_s3 }
  0x35   :  { %v193_v4 = vsub.s32 0, %v871_v1  ;;  %v197_v5 = vsub.s32 1, %v871_v1  ;;  %v201_v6 = vsub.s32 2, %v871_v1  ;;  %v1124_v7 = vsub.s32 3, %v871_v1  ;;  %s772_s11 = scalar_lea.vmem %s629_s3, 128  ;;  %p777_p7 = scmp.lt.s32.totalorder %s629_s3, %s629_s3 }
  0x36   :  { %v209_v11 = vsub.s32 4, %v871_v1  ;;  %v213_v12 = vsub.s32 5, %v871_v1  ;;  %v217_v13 = vsub.s32 6, %v871_v1  ;;  %v221_v14 = vsub.s32 7, %v871_v1  ;;  %p773_p6 = scmp.ne.s32.totalorder %s629_s3, %s772_s11  ;;  %p778_p8 = scmp.lt.s32.totalorder %s772_s11, %s772_s11 }
  0x37   :  { %v892_v19 = vrot.slane %v880_v9, %v193_v4  ;;  %v897_v20 = vrot.slane %v880_v9, %v197_v5  ;;  %v902_v21 = vrot.slane %v880_v9, %v201_v6  ;;  %v907_v28 = vrot.slane %v880_v9, %v1124_v7 }
  0x38   :  { %v79_v30 = vmax.f32 %v882_v10, %v78_v18  ;;  %v85_v34 = vmax.f32 %v71_v15, %v84_v25  ;;  %v91_v35 = vmax.f32 %v72_v16, %v90_v26  ;;  %v97_v36 = vmax.f32 %v73_v17, %v96_v27  ;;  %p779_p9 = por %p778_p8, %p777_p7 }
  0x39   :  { %v120_v37 = vrot.slane %v77_v29, 4  ;;  %v103_v39 = vmax.f32 %v74_v22, %v102_v31  ;;  %v109_v40 = vmax.f32 %v75_v23, %v108_v32  ;;  %v115_v41 = vmax.f32 %v76_v24, %v114_v33 }
  0x3a   :  { %v80_v38 = vrot.slane %v79_v30, 2  ;;  %v86_v42 = vrot.slane %v85_v34, 2  ;;  %v92_v43 = vrot.slane %v91_v35, 2  ;;  %v98_v44 = vrot.slane %v97_v36, 2  ;;  %p780_p10 = pnand %p779_p9, %p773_p6 }
  0x3b   :  { %v121_v45 = vmax.f32 %v77_v29, %v120_v37  ;;  %v104_v47 = vrot.slane %v103_v39, 2  ;;  %v110_v48 = vrot.slane %v109_v40, 2  ;;  %v116_v49 = vrot.slane %v115_v41, 2 }
  0x3c   :  { %v81_v46 = vmax.f32 %v79_v30, %v80_v38  ;;  %v87_v50 = vmax.f32 %v85_v34, %v86_v42  ;;  %v93_v51 = vmax.f32 %v91_v35, %v92_v43  ;;  %v99_v52 = vmax.f32 %v97_v36, %v98_v44 }
  0x3d   :  { %v122_v53 = vrot.slane %v121_v45, 2  ;;  %v105_v55 = vmax.f32 %v103_v39, %v104_v47  ;;  %v111_v56 = vmax.f32 %v109_v40, %v110_v48  ;;  %v117_v57 = vmax.f32 %v115_v41, %v116_v49 }
  0x3e   :  { %v82_v54 = vrot.slane %v81_v46, 1  ;;  %v88_v58 = vrot.slane %v87_v50, 1  ;;  %v94_v59 = vrot.slane %v93_v51, 1  ;;  %v100_v60 = vrot.slane %v99_v52, 1 }
  0x3f   :  { %v123_v61 = vmax.f32 %v121_v45, %v122_v53  ;;  %v106_v63 = vrot.slane %v105_v55, 1  ;;  %v112_v0 = vrot.slane %v111_v56, 1  ;;  %v118_v2 = vrot.slane %v117_v57, 1 }
  0x40   :  { %v83_v62 = vmax.f32 %v81_v46, %v82_v54  ;;  %v89_v30 = vmax.f32 %v87_v50, %v88_v58  ;;  %v95_v38 = vmax.f32 %v93_v51, %v94_v59  ;;  %v101_v8 = vmax.f32 %v99_v52, %v100_v60 }
  0x41   :  { %v124_v7 = vrot.slane %v123_v61, 1  ;;  %v107_v34 = vmax.f32 %v105_v55, %v106_v63  ;;  %v113_v35 = vmax.f32 %v111_v56, %v112_v0  ;;  %v119_v36 = vmax.f32 %v117_v57, %v118_v2 }
  0x42   :  { %v127_v42 = vadd.f32 %v78_v18, %v882_v10  ;;  %v133_v40 = vadd.f32 %v84_v25, %v71_v15  ;;  %v139_v41 = vadd.f32 %v90_v26, %v72_v16  ;;  %v145_v43 = vadd.f32 %v96_v27, %v73_v17 }
  0x43   :  { %v125_v39 = vmax.f32 %v123_v61, %v124_v7  ;;  %v151_v47 = vadd.f32 %v102_v31, %v74_v22  ;;  %v157_v45 = vadd.f32 %v108_v32, %v75_v23  ;;  %v163_v46 = vadd.f32 %v114_v33, %v76_v24 }
  0x44   :  { %v128_v44 = vrot.slane %v127_v42, 2  ;;  %v134_v48 = vrot.slane %v133_v40, 2  ;;  %v140_v49 = vrot.slane %v139_v41, 2  ;;  %v146_v53 = vrot.slane %v145_v43, 2 }
  0x45   :  { %v169_v50 = vadd.f32 %v120_v37, %v77_v29  ;;  %v152_v52 = vrot.slane %v151_v47, 2  ;;  %v158_v54 = vrot.slane %v157_v45, 2  ;;  %v164_v55 = vrot.slane %v163_v46, 2 }
  0x46   :  { %v129_v51 = vadd.f32 %v128_v44, %v127_v42  ;;  %v135_v56 = vadd.f32 %v134_v48, %v133_v40  ;;  %v141_v57 = vadd.f32 %v140_v49, %v139_v41  ;;  %v147_v58 = vadd.f32 %v146_v53, %v145_v43 }
  0x47   :  { %v170_v10 = vrot.slane %v169_v50, 2  ;;  %v153_v15 = vadd.f32 %v152_v52, %v151_v47  ;;  %v159_v16 = vadd.f32 %v158_v54, %v157_v45  ;;  %v165_v17 = vadd.f32 %v164_v55, %v163_v46  ;;  %v69_v54 = vld [vmem:[#allocation8] sm:$0xff] }
  0x48   :  { %v130_v7 = vrot.slane %v129_v51, 1  ;;  %v136_v18 = vrot.slane %v135_v56, 1  ;;  %v142_v22 = vrot.slane %v141_v57, 1  ;;  %v148_v23 = vrot.slane %v147_v58, 1 }
  0x49   :  { %v171_v24 = vadd.f32 %v170_v10, %v169_v50  ;;  %v154_v26 = vrot.slane %v153_v15, 1  ;;  %v160_v27 = vrot.slane %v159_v16, 1  ;;  %v166_v29 = vrot.slane %v165_v17, 1 }
  0x4a   :  { %v131_v25 = vadd.f32 %v130_v7, %v129_v51  ;;  %v137_v31 = vadd.f32 %v136_v18, %v135_v56  ;;  %v143_v32 = vadd.f32 %v142_v22, %v141_v57  ;;  %v149_v33 = vadd.f32 %v148_v23, %v147_v58 }
  0x4b   :  { %v172_v37 = vrot.slane %v171_v24, 1  ;;  %v155_v59 = vadd.f32 %v154_v26, %v153_v15  ;;  %v161_v60 = vadd.f32 %v160_v27, %v159_v16  ;;  %v167_v61 = vadd.f32 %v166_v29, %v165_v17  ;;  %v979_v26 = vld [vmem:[#allocation5] sm:$0xff] }
  0x4c   :  { %v174_v63 = vmul.f32 0.125, %v131_v25  ;;  %v175_v2 = vmul.f32 0.125, %v137_v31  ;;  %v176_v42 = vmul.f32 0.125, %v143_v32  ;;  %v177_v40 = vmul.f32 0.125, %v149_v33  ;;  %v989_v32 = vld [vmem:[#allocation5 + $0x8] sm:$0xff]  ;;  %v991_v33 = vld [vmem:[#allocation5 + $0x10] sm:$0xff] }
  0x4d   :  { %v173_v0 = vadd.f32 %v172_v37, %v171_v24  ;;  %v178_v41 = vmul.f32 0.125, %v155_v59  ;;  %v179_v43 = vmul.f32 0.125, %v161_v60  ;;  %v180_v44 = vmul.f32 0.125, %v167_v61  ;;  %v993_v37 = vld [vmem:[#allocation5 + $0x18] sm:$0xff] }
  0x4e   :  { %v182_v47 = vadd.f32 %v174_v63, %v83_v62  ;;  %v183_v46 = vadd.f32 %v175_v2, %v89_v30  ;;  %v184_v48 = vadd.f32 %v176_v42, %v95_v38  ;;  %v185_v49 = vadd.f32 %v177_v40, %v101_v8  ;;  %v1005_v2 = vld [vmem:[#allocation5 + $0x28] sm:$0xff] }
  0x4f   :  { %v181_v45 = vmul.f32 0.125, %v173_v0  ;;  %v186_v53 = vadd.f32 %v178_v41, %v107_v34  ;;  %v187_v50 = vadd.f32 %v179_v43, %v113_v35  ;;  %v188_v51 = vadd.f32 %v180_v44, %v119_v36  ;;  %v1003_v0 = vld [vmem:[#allocation5 + $0x20] sm:$0xff] }
  0x50   :  { %v914_v52 = vrot.slane %v880_v9, %v209_v11  ;;  %v919_v56 = vrot.slane %v880_v9, %v213_v12  ;;  %v924_v62 = vrot.slane %v880_v9, %v217_v13  ;;  %v929_v8 = vrot.slane %v880_v9, %v221_v14 }
  0x51   :  { %v189_v55 = vadd.f32 %v181_v45, %v125_v39  ;;  %v231_v30 = vmul.f32 %v892_v19, %v182_v47  ;;  %v232_v38 = vmul.f32 %v897_v20, %v183_v46  ;;  %v233_v34 = vmul.f32 %v902_v21, %v184_v48 }
  0x52   :  { %v234_v35 = vmul.f32 %v907_v28, %v185_v49  ;;  %v235_v36 = vmul.f32 %v914_v52, %v186_v53  ;;  %v236_v39 = vmul.f32 %v919_v56, %v187_v50  ;;  %v237_v57 = vmul.f32 %v924_v62, %v188_v51 }
  0x53   :  { %v238_v58 = vmul.f32 %v929_v8, %v189_v55  ;;  %v941_v9 = vrot.slane %v69_v54, %v193_v4  ;;  %v945_v10 = vrot.slane %v69_v54, %v197_v5  ;;  %v949_v7 = vrot.slane %v69_v54, %v201_v6 }
  0x54   :  { %v1128_v15 = vsub.s32 3, %v871_v1  ;;  %v957_v17 = vrot.slane %v69_v54, %v209_v11  ;;  %v961_v4 = vrot.slane %v69_v54, %v213_v12  ;;  %v965_v5 = vrot.slane %v69_v54, %v217_v13 }
  0x55   :  { %v969_v6 = vrot.slane %v69_v54, %v221_v14  ;;  %v280_v18 = vadd.f32 %v941_v9, %v231_v30  ;;  %v281_v22 = vadd.f32 %v945_v10, %v232_v38  ;;  %v282_v23 = vadd.f32 %v949_v7, %v233_v34 }
  0x56   :  { %v953_v16 = vrot.slane %v69_v54, %v1128_v15  ;;  %v284_v24 = vadd.f32 %v957_v17, %v235_v36  ;;  %v285_v12 = vadd.f32 %v961_v4, %v236_v39  ;;  %v286_v25 = vadd.f32 %v965_v5, %v237_v57  ;;  %v1026_v57 = vld [vmem:[#allocation5 + $0x30] sm:$0xff] }
  0x57   :  { %1129 = vst [vmem:[#allocation18_spill] sm:$0xff] %v969_v6  ;;  %v287_v13 = vadd.f32 %v969_v6, %v238_v58  ;;  %v981_v14 = vmul.f32 0.5, %v280_v18  ;;  %v983_v27 = vmul.f32 0.5, %v281_v22  ;;  %v985_v29 = vmul.f32 0.5, %v282_v23 }
  0x58   :  { %v283_v11 = vadd.f32 %v953_v16, %v234_v35  ;;  %v995_v59 = vmul.f32 0.5, %v284_v24  ;;  %v997_v60 = vmul.f32 0.5, %v285_v12  ;;  %v999_v61 = vmul.f32 0.5, %v286_v25 }
  0x59   :  { %v1001_v63 = vmul.f32 0.5, %v287_v13  ;;  %v296_v42 = vmul.f32 0.70710677, %v280_v18  ;;  %v297_v40 = vmul.f32 0.70710677, %v281_v22  ;;  %v1130_v45 = vunpack.c.0.s8 %v873_v3  ;;  %v1028_v22 = vld [vmem:[#allocation5 + $0x38] sm:$0xff] }
  0x5a   :  { %v987_v31 = vmul.f32 0.5, %v283_v11  ;;  %v298_v41 = vmul.f32 0.70710677, %v282_v23  ;;  %v299_v43 = vmul.f32 0.70710677, %v283_v11  ;;  %v395_v53 = vrot.slane %v979_v26, 4 }
  0x5b   :  { %v300_v44 = vmul.f32 0.70710677, %v284_v24  ;;  %v301_v47 = vmul.f32 0.70710677, %v285_v12  ;;  %v1010_v46 = vsub.s32 %v1130_v45, %v871_v1  ;;  %v302_v48 = vmul.f32 0.70710677, %v286_v25 }
  0x5c   :  { %v303_v49 = vmul.f32 0.70710677, %v287_v13  ;;  %660 = verf.f32 %v296_v42  ;;  %v401_v50 = vrot.slane %v989_v32, 4  ;;  %v407_v51 = vrot.slane %v991_v33, 4 }
  0x5d   :  { %662 = verf.f32 %v297_v40  ;;  %v413_v54 = vrot.slane %v993_v37, 4  ;;  %v396_v55 = vmax.f32 %v979_v26, %v395_v53  ;;  %v419_v30 = vrot.slane %v1003_v0, 4 }
  0x5e   :  { %664 = verf.f32 %v298_v41  ;;  %v1125_v1 = vrot.slane %v1005_v2, 4  ;;  %v402_v3 = vmax.f32 %v989_v32, %v401_v50  ;;  %v408_v38 = vmax.f32 %v991_v33, %v407_v51 }
  0x5f   :  { %666 = verf.f32 %v299_v43  ;;  %v414_v34 = vmax.f32 %v993_v37, %v413_v54  ;;  %v397_v35 = vrot.slane %v396_v55, 2  ;;  %v420_v36 = vmax.f32 %v1003_v0, %v419_v30 }
  0x60   :  { %668 = verf.f32 %v300_v44  ;;  %v426_v39 = vmax.f32 %v1005_v2, %v1125_v1  ;;  %v403_v58 = vrot.slane %v402_v3, 2  ;;  %v409_v15 = vrot.slane %v408_v38, 2 }
  0x61   :  { %670 = verf.f32 %v301_v47  ;;  %v415_v18 = vrot.slane %v414_v34, 2  ;;  %v398_v23 = vmax.f32 %v396_v55, %v397_v35  ;;  %v421_v11 = vrot.slane %v420_v36, 2 }
  0x62   :  { %672 = verf.f32 %v302_v48  ;;  %v427_v24 = vrot.slane %v426_v39, 2  ;;  %v404_v12 = vmax.f32 %v402_v3, %v403_v58  ;;  %v410_v25 = vmax.f32 %v408_v38, %v409_v15 }
  0x63   :  { %674 = verf.f32 %v303_v49  ;;  %v416_v13 = vmax.f32 %v414_v34, %v415_v18  ;;  %v399_v42 = vrot.slane %v398_v23, 1  ;;  %v422_v40 = vmax.f32 %v420_v36, %v421_v11 }
  0x64   :  { %v428_v41 = vmax.f32 %v426_v39, %v427_v24  ;;  %v431_v43 = vrot.slane %v1026_v57, 4  ;;  %v405_v44 = vrot.slane %v404_v12, 1  ;;  %v411_v47 = vrot.slane %v410_v25, 1 }
  0x65   :  { %v417_v45 = vrot.slane %v416_v13, 1  ;;  %v1127_v1 = vrot.slane %v1028_v22, 4  ;;  %v1032_v48 = vmax.f32 %v398_v23, %v399_v42  ;;  %v423_v6 = vrot.slane %v422_v40, 1 }
  0x66   :  { %v429_v55 = vrot.slane %v428_v41, 1  ;;  %v432_v49 = vmax.f32 %v1026_v57, %v431_v43  ;;  %v1037_v3 = vmax.f32 %v404_v12, %v405_v44  ;;  %v1039_v38 = vmax.f32 %v410_v25, %v411_v47 }
  0x67   :  { %v1041_v34 = vmax.f32 %v416_v13, %v417_v45  ;;  %v438_v35 = vmax.f32 %v1028_v22, %v1127_v1  ;;  %v1046_v36 = vmax.f32 %v422_v40, %v423_v6  ;;  %v444_v15 = vadd.f32 %v395_v53, %v979_v26 }
  0x68   :  { %v1048_v39 = vmax.f32 %v428_v41, %v429_v55  ;;  %v433_v58 = vrot.slane %v432_v49, 2  ;;  %v450_v11 = vadd.f32 %v401_v50, %v989_v32  ;;  %v456_v24 = vadd.f32 %v407_v51, %v991_v33 }
  0x69   :  { %v661_v18 = vpop.eup %660  ;;  %v439_v23 = vrot.slane %v438_v35, 2  ;;  %v462_v12 = vadd.f32 %v413_v54, %v993_v37  ;;  %v445_v44 = vrot.slane %v444_v15, 2  ;;  %v468_v6 = vadd.f32 %v419_v30, %v1003_v0 }
  0x6a   :  { %v663_v25 = vpop.eup %662  ;;  %v312_v13 = vadd.f32 1.0, %v661_v18  ;;  %v434_v42 = vmax.f32 %v432_v49, %v433_v58  ;;  %v451_v45 = vrot.slane %v450_v11, 2  ;;  %v457_v55 = vrot.slane %v456_v24, 2 }
  0x6b   :  { %v665_v40 = vpop.eup %664  ;;  %v313_v41 = vadd.f32 1.0, %v663_v25  ;;  %v440_v47 = vmax.f32 %v438_v35, %v439_v23  ;;  %v446_v50 = vadd.f32 %v445_v44, %v444_v15 }
  0x6c   :  { %v667_v26 = vpop.eup %666  ;;  %v314_v53 = vadd.f32 1.0, %v665_v40  ;;  %v320_v1 = vmul.f32 %v312_v13, %v981_v14  ;;  %v435_v32 = vrot.slane %v434_v42, 1  ;;  %v452_v49 = vadd.f32 %v451_v45, %v450_v11 }
  0x6d   :  { %v669_v33 = vpop.eup %668  ;;  %v315_v51 = vadd.f32 1.0, %v667_v26  ;;  %v321_v37 = vmul.f32 %v313_v41, %v983_v27  ;;  %v441_v54 = vrot.slane %v440_v47, 1  ;;  %v447_v35 = vrot.slane %v446_v50, 1 }
  0x6e   :  { %v671_v58 = vpop.eup %670  ;;  %v316_v18 = vadd.f32 1.0, %v669_v33  ;;  %v322_v0 = vmul.f32 %v314_v53, %v985_v29  ;;  %v1058_v30 = vmax.f32 %v434_v42, %v435_v32  ;;  %v453_v11 = vrot.slane %v452_v49, 1 }
  0x6f   :  { %v673_v23 = vpop.eup %672  ;;  %v317_v25 = vadd.f32 1.0, %v671_v58  ;;  %v323_v40 = vmul.f32 %v315_v51, %v987_v31  ;;  %v336_v14 = vcombine.low %v320_v1, %v321_v37  ;;  %v1061_v13 = vmax.f32 %v440_v47, %v441_v54 }
  0x70   :  { %v675_v15 = vpop.eup %674  ;;  %v318_v44 = vadd.f32 1.0, %v673_v23  ;;  %v324_v27 = vmul.f32 %v316_v18, %v995_v59  ;;  %v448_v41 = vadd.f32 %v447_v35, %v446_v50  ;;  %v454_v32 = vadd.f32 %v453_v11, %v452_v49 }
  0x71   :  { %v319_v45 = vadd.f32 1.0, %v675_v15  ;;  %v325_v26 = vmul.f32 %v317_v25, %v997_v60  ;;  %v337_v29 = vcombine.low %v322_v0, %v323_v40  ;;  %v346_v42 = vrot.slane %v336_v14, %v1010_v46 }
  0x72   :  { %v326_v53 = vmul.f32 %v318_v44, %v999_v61  ;;  %v458_v33 = vadd.f32 %v457_v55, %v456_v24  ;;  %v463_v31 = vrot.slane %v462_v12, 2  ;;  %v469_v37 = vrot.slane %v468_v6, 2 }
  0x73   :  { %v327_v1 = vmul.f32 %v319_v45, %v1001_v63  ;;  %v338_v47 = vcombine.low %v324_v27, %v325_v26  ;;  %v353_v51 = vrot.slane %v337_v29, %v1010_v46  ;;  %v1131_v54 = vrot.slane %v1005_v2, 4 }
  0x74   :  { %v459_v59 = vrot.slane %v458_v33, 1  ;;  %v464_v50 = vadd.f32 %v463_v31, %v462_v12  ;;  %v480_v58 = vadd.f32 %v431_v43, %v1026_v57  ;;  %v470_v49 = vadd.f32 %v469_v37, %v468_v6 }
  0x75   :  { %v474_v60 = vadd.f32 %v1131_v54, %v1005_v2  ;;  %v339_v61 = vcombine.low %v326_v53, %v327_v1  ;;  %v360_v24 = vrot.slane %v338_v47, %v1010_v46  ;;  %v368_v55 = vcombine.low %v346_v42, %v353_v51 }
  0x76   :  { %v460_v63 = vadd.f32 %v459_v59, %v458_v33  ;;  %v465_v18 = vrot.slane %v464_v50, 1  ;;  %v481_v35 = vrot.slane %v480_v58, 2  ;;  %v471_v25 = vrot.slane %v470_v49, 1 }
  0x77   :  { %v475_v0 = vrot.slane %v474_v60, 2  ;;  %v367_v23 = vrot.slane %v339_v61, %v1010_v46  ;;  %v376_v12 = vrot.slane %v368_v55, %v1010_v46  ;;  %v1132_v2 = vrot.slane %v1028_v22, 4 }
  0x78   :  { %v466_v14 = vadd.f32 %v465_v18, %v464_v50  ;;  %v482_v43 = vadd.f32 %v481_v35, %v480_v58  ;;  %v491_v15 = vmul.f32 0.125, %v448_v41  ;;  %v472_v27 = vadd.f32 %v471_v25, %v470_v49 }
  0x79   :  { %v486_v40 = vadd.f32 %v1132_v2, %v1028_v22  ;;  %v476_v57 = vadd.f32 %v475_v0, %v474_v60  ;;  %v369_v44 = vcombine.low %v360_v24, %v367_v23  ;;  %v492_v11 = vmul.f32 0.125, %v454_v32 }
  0x7a   :  { %v483_v26 = vrot.slane %v482_v43, 1  ;;  %v493_v29 = vmul.f32 0.125, %v460_v63  ;;  %v494_v42 = vmul.f32 0.125, %v466_v14  ;;  %v495_v31 = vmul.f32 0.125, %v472_v27 }
  0x7b   :  { %v487_v6 = vrot.slane %v486_v40, 2  ;;  %v477_v45 = vrot.slane %v476_v57, 1  ;;  %v383_v53 = vrot.slane %v369_v44, %v1010_v46  ;;  %v499_v22 = vadd.f32 %v491_v15, %v1032_v48 }
  0x7c   :  { %v484_v47 = vadd.f32 %v483_v26, %v482_v43  ;;  %v500_v41 = vadd.f32 %v492_v11, %v1037_v3  ;;  %v501_v51 = vadd.f32 %v493_v29, %v1039_v38  ;;  %v502_v59 = vadd.f32 %v494_v42, %v1041_v34 }
  0x7d   :  { %v488_v33 = vadd.f32 %v487_v6, %v486_v40  ;;  %v478_v1 = vadd.f32 %v477_v45, %v476_v57  ;;  %v384_v37 = vcombine.low %v376_v12, %v383_v53  ;;  %v503_v50 = vadd.f32 %v495_v31, %v1046_v36 }
  0x7e   :  { %v497_v60 = vmul.f32 0.125, %v484_v47  ;;  %v507_v58 = vmul.f32 %v499_v22, %v892_v19  ;;  %v508_v61 = vmul.f32 %v500_v41, %v897_v20  ;;  %v509_v24 = vmul.f32 %v501_v51, %v902_v21 }
  0x7f   :  { %v489_v32 = vrot.slane %v488_v33, 1  ;;  %v496_v54 = vmul.f32 0.125, %v478_v1  ;;  %386 = vst [vmem:[#allocation10] sm:$0xff] %v384_v37  ;;  %v510_v3 = vmul.f32 %v502_v59, %v907_v28  ;;  %v511_v38 = vmul.f32 %v503_v50, %v914_v52 }
  0x80   :  { %v505_v34 = vadd.f32 %v497_v60, %v1058_v30  ;;  %v515_v36 = vadd.f32 %v507_v58, %v941_v9  ;;  %v516_v49 = vadd.f32 %v508_v61, %v945_v10 }
  0x81   :  { %v490_v48 = vadd.f32 %v489_v32, %v488_v33  ;;  %v504_v55 = vadd.f32 %v496_v54, %v1048_v39 }
  0x82   :  { %783 = shalt.err (!%p780_p10)
}
  0x83   :  { %631 = dma.vmem_to_hbm [thread:$0]  %s629_s3, 128, %s1122_s4, [#allocation4]   ;;  %v498_v19 = vmul.f32 0.125, %v490_v48  ;;  %v517_v20 = vadd.f32 %v509_v24, %v949_v7  ;;  %v512_v21 = vmul.f32 %v504_v55, %v919_v56  ;;  %v513_v28 = vmul.f32 %v505_v34, %v924_v62  ;;  %v1133_v23 = vld [vmem:[#allocation18_spill] sm:$0xff] }
  0x84   :  { %v518_v52 = vadd.f32 %v510_v3, %v953_v16  ;;  %v519_v10 = vadd.f32 %v511_v38, %v957_v17  ;;  %v531_v30 = vmul.f32 0.70710677, %v515_v36  ;;  %v532_v63 = vmul.f32 0.70710677, %v516_v49  ;;  %s828_s4 = smov [#allocation11]  }
  0x85   :  { %v506_v9 = vadd.f32 %v498_v19, %v1061_v13  ;;  %v520_v39 = vadd.f32 %v512_v21, %v961_v4  ;;  %v521_v0 = vadd.f32 %v513_v28, %v965_v5  ;;  %v533_v35 = vmul.f32 0.70710677, %v517_v20  ;;  %s638_s14 = sshll.u32 %s828_s4, 4  ;;  %s639_s14 = int_to_ptr.vmem [resolvable:$true] %s638_s14 }
  0x86   :  { %v534_v7 = vmul.f32 0.70710677, %v518_v52  ;;  %v535_v12 = vmul.f32 0.70710677, %v519_v10  ;;  %676 = verf.f32 %v531_v30  ;;  %v523_v17 = vmul.f32 0.5, %v515_v36  ;;  %s792_s15 = scalar_lea.vmem %s639_s14, 128  ;;  %p797_p12 = scmp.lt.s32.totalorder %s639_s14, %s639_s14 }
  0x87   :  { %v514_v18 = vmul.f32 %v506_v9, %v929_v8  ;;  %v536_v62 = vmul.f32 0.70710677, %v520_v39  ;;  %678 = verf.f32 %v532_v63  ;;  %v537_v16 = vmul.f32 0.70710677, %v521_v0  ;;  %p793_p11 = scmp.ne.s32.totalorder %s639_s14, %s792_s15  ;;  %p798_p13 = scmp.lt.s32.totalorder %s792_s15, %s792_s15 }
  0x88   :  { %680 = verf.f32 %v533_v35  ;;  %v524_v4 = vmul.f32 0.5, %v516_v49  ;;  %v525_v25 = vmul.f32 0.5, %v517_v20  ;;  %v526_v14 = vmul.f32 0.5, %v518_v52 }
  0x89   :  { %v522_v56 = vadd.f32 %v514_v18, %v1133_v23  ;;  %682 = verf.f32 %v534_v7  ;;  %v527_v15 = vmul.f32 0.5, %v519_v10  ;;  %v528_v11 = vmul.f32 0.5, %v520_v39  ;;  %p799_p0 = por %p798_p13, %p797_p12 }
  0x8a   :  { %684 = verf.f32 %v535_v12  ;;  %v529_v42 = vmul.f32 0.5, %v521_v0 }
  0x8b   :  { %v538_v13 = vmul.f32 0.70710677, %v522_v56  ;;  %686 = verf.f32 %v536_v62  ;;  %v530_v22 = vmul.f32 0.5, %v522_v56  ;;  %p800_p1 = pnand %p799_p0, %p793_p11 }
  0x8c   :  { %688 = verf.f32 %v537_v16 }
  0x8d   :  { %690 = verf.f32 %v538_v13 }
  0x93   :  { %v677_v8 = vpop.eup %676 }
  0x94   :  { %v679_v5 = vpop.eup %678  ;;  %v547_v2 = vadd.f32 1.0, %v677_v8 }
  0x95   :  { %v681_v40 = vpop.eup %680  ;;  %v548_v57 = vadd.f32 1.0, %v679_v5 }
  0x96   :  { %v683_v43 = vpop.eup %682  ;;  %v549_v44 = vadd.f32 1.0, %v681_v40  ;;  %v555_v27 = vmul.f32 %v547_v2, %v523_v17 }
  0x97   :  { %v685_v6 = vpop.eup %684  ;;  %v550_v45 = vadd.f32 1.0, %v683_v43  ;;  %v556_v26 = vmul.f32 %v548_v57, %v524_v4 }
  0x98   :  { %v687_v29 = vpop.eup %686  ;;  %v551_v53 = vadd.f32 1.0, %v685_v6  ;;  %v557_v33 = vmul.f32 %v549_v44, %v525_v25 }
  0x99   :  { %v689_v31 = vpop.eup %688  ;;  %v552_v1 = vadd.f32 1.0, %v687_v29  ;;  %v558_v47 = vmul.f32 %v550_v45, %v526_v14  ;;  %v571_v41 = vcombine.low %v555_v27, %v556_v26 }
  0x9a   :  { %v691_v51 = vpop.eup %690  ;;  %v553_v37 = vadd.f32 1.0, %v689_v31  ;;  %v559_v32 = vmul.f32 %v551_v53, %v527_v15 }
  0x9b   :  { %v554_v59 = vadd.f32 1.0, %v691_v51  ;;  %v560_v50 = vmul.f32 %v552_v1, %v528_v11  ;;  %v572_v54 = vcombine.low %v557_v33, %v558_v47  ;;  %v581_v60 = vrot.slane %v571_v41, %v1010_v46 }
  0x9c   :  { %v561_v58 = vmul.f32 %v553_v37, %v529_v42 }
  0x9d   :  { %v562_v61 = vmul.f32 %v554_v59, %v530_v22  ;;  %v573_v48 = vcombine.low %v559_v32, %v560_v50  ;;  %v588_v24 = vrot.slane %v572_v54, %v1010_v46 }
  0x9f   :  { %v574_v3 = vcombine.low %v561_v58, %v562_v61  ;;  %v595_v38 = vrot.slane %v573_v48, %v1010_v46  ;;  %v603_v55 = vcombine.low %v581_v60, %v588_v24 }
  0xa1   :  { %v602_v34 = vrot.slane %v574_v3, %v1010_v46  ;;  %v611_v49 = vrot.slane %v603_v55, %v1010_v46 }
  0xa3   :  { %v604_v36 = vcombine.low %v595_v38, %v602_v34 }
  0xa5   :  { %v618_v19 = vrot.slane %v604_v36, %v1010_v46 }
  0xa7   :  { %v619_v20 = vcombine.low %v611_v49, %v618_v19 }
  0xa9   :  { %621 = vst [vmem:[#allocation11] sm:$0xff] %v619_v20 }
  0xaa   :  { %803 = shalt.err (!%p800_p1)
}
  0xab   :  { %641 = dma.vmem_to_hbm [thread:$0]  %s639_s14, 128, %s1123_s5, [#allocation12]  }
  0xac   :  { %818 = dma.done.wait [#allocation4], 128  }
  0xad   :  { %819 = vsyncadd [#allocation4], 4294967168 }
  0xae   :  { %820 = dma.done.wait [#allocation12], 128  }
  0xaf   :  { %821 = vsyncadd [#allocation12], 4294967168 }
  0xb0   :  { %648 = vsyncpa [#allocation3], 1 }
  0xb1   :  { %649 = vsyncpa [#allocation6], 1 }
  0xb2   :  { %650 = vsyncpa [#allocation9], 1 }
  0xb3   :  { %651 = vsyncpa [#allocation4], 1 }
  0xb4   :  { %652 = vsyncpa [#allocation12], 1 }

</bundles_post_ra>
